<compile_context>
chip_gen: v7x
topology: tpu7x:2x2x1
jax: 0.10.0
libtpu: 0.0.40
codegen_flags: <defaults>
</compile_context>

<pallas_src>
import functools

import jax
import jax.numpy as jnp
from jax.experimental import pallas as pl
from jax.experimental.pallas import tpu as pltpu

_EPS = 1e-12
_TWO_PASS_VMEM_LIMIT = 32 * 1024 * 1024   # safe scoped-VMEM budget on v5e/v6e/v7x
_LANE_CHOICES = (512, 256, 128)           # lane-dense slab widths (multiples of 128)


def _round_up(a, b):
    return -(-a // b) * b


def _choose_lane_width(n):
    for w in _LANE_CHOICES:
        if n % w == 0:
            return w
    return None


def _tpu_vmem_capacity_bytes():
    """Best-effort VMEM capacity query; None if unavailable."""
    try:
        return int(pltpu.get_tpu_info().vmem_capacity_bytes)
    except Exception:
        return None


# ----------------------------------------------------------------------------
# Shared math (used in-kernel, in host glue and in the pure-JAX reference so the
# formulation is identical everywhere).
# ----------------------------------------------------------------------------
def _scale_zp(mn, mx, *, min_val, max_val, is_symmetric, eps=_EPS):
    if is_symmetric:
        scale = jnp.maximum(jnp.abs(mn), jnp.abs(mx)) / max_val
    else:
        scale = (mx - mn) / (max_val - min_val)
    # eps guard (deviation from the reference only for constant/all-zero tensors,
    # where the reference produces NaN).
    scale = jnp.maximum(scale.astype(jnp.float32), jnp.float32(eps))
    if is_symmetric:
        zp = jnp.float32(0.0)
    else:
        # reference: (min_val - min/scale).round().to(int32); value is integral already.
        zp = jnp.round(min_val - mn / scale)
    return scale, zp


def _apply_fakequant(x_f32, scale, inv_scale, zp, min_val, max_val, out_dtype):
    q = jnp.clip(jnp.round(x_f32 * inv_scale + zp), min_val, max_val)
    return ((q - zp) * scale).astype(out_dtype)


# ----------------------------------------------------------------------------
# Fused single-pass kernel (tensor fits comfortably in VMEM: read x once).
# ----------------------------------------------------------------------------
def _fused_kernel(x_ref, o_ref, *, min_val, max_val, is_symmetric):
    x = x_ref[...].astype(jnp.float32)
    mn = jnp.min(x)
    mx = jnp.max(x)
    scale, zp = _scale_zp(mn, mx, min_val=min_val, max_val=max_val,
                          is_symmetric=is_symmetric)
    inv_scale = 1.0 / scale
    o_ref[...] = _apply_fakequant(x, scale, inv_scale, zp, min_val, max_val, o_ref.dtype)


def _fused_call(x2, out_dtype, *, min_val, max_val, is_symmetric, vmem_limit_bytes):
    rows, lane_w = x2.shape
    kernel = functools.partial(_fused_kernel, min_val=min_val, max_val=max_val,
                               is_symmetric=is_symmetric)
    return pl.pallas_call(
        kernel,
        out_shape=jax.ShapeDtypeStruct((rows, lane_w), out_dtype),
        grid_spec=pltpu.PrefetchScalarGridSpec(
            num_scalar_prefetch=0,
            grid=(1,),
            in_specs=[pl.BlockSpec((rows, lane_w), lambda i: (0, 0))],
            out_specs=pl.BlockSpec((rows, lane_w), lambda i: (0, 0))),
        compiler_params=pltpu.CompilerParams(
            dimension_semantics=("arbitrary",),
            vmem_limit_bytes=vmem_limit_bytes),
    )(x2)


# ----------------------------------------------------------------------------
# Two-pass path for large tensors.
# Pass 1: tiled min/max reduction with vreg-shaped accumulators.
# ----------------------------------------------------------------------------
def _minmax_kernel(x_ref, mn_ref, mx_ref, *, tile_rows, valid_rows, n_inner):
    c = pl.program_id(0)          # core-split ("parallel") axis
    i = pl.program_id(1)          # reduction ("arbitrary") axis
    tile_idx = c * n_inner + i    # global (logical) tile index; may overhang by one

    @pl.when(i == 0)
    def _():
        mn_ref[...] = jnp.full(mn_ref.shape, jnp.inf, jnp.float32)
        mx_ref[...] = jnp.full(mx_ref.shape, -jnp.inf, jnp.float32)

    row0 = tile_idx * tile_rows
    is_full_tile = row0 + tile_rows <= valid_rows
    lane_w = x_ref.shape[-1]

    # Fast path (every tile but at most one): cast + pure elementwise min/max accumulate.
    @pl.when(is_full_tile)
    def _():
        x = x_ref[...].astype(jnp.float32).reshape(tile_rows // 8, 8, lane_w)
        mn_ref[...] = jnp.minimum(mn_ref[...], x.min(axis=0))
        mx_ref[...] = jnp.maximum(mx_ref[...], x.max(axis=0))

    # Slow path: partial last tile and/or the overhanging tile of the odd core split.
    # Out-of-range rows (including garbage rows read past the array end) are masked.
    @pl.when(jnp.logical_not(is_full_tile))
    def _():
        x = x_ref[...].astype(jnp.float32)
        rid = row0 + jax.lax.broadcasted_iota(jnp.int32, x.shape, 0)
        valid = rid < valid_rows
        x_lo = jnp.where(valid, x, jnp.inf).reshape(tile_rows // 8, 8, lane_w)
        x_hi = jnp.where(valid, x, -jnp.inf).reshape(tile_rows // 8, 8, lane_w)
        mn_ref[...] = jnp.minimum(mn_ref[...], x_lo.min(axis=0))
        mx_ref[...] = jnp.maximum(mx_ref[...], x_hi.max(axis=0))


# Pass 2: elementwise fake quantization; qparams come in through SMEM.
def _quant_kernel(params_ref, x_ref, o_ref, *, min_val, max_val):
    inv_scale = params_ref[0]
    scale = params_ref[1]
    zp = params_ref[2]
    x = x_ref[...].astype(jnp.float32)
    o_ref[...] = _apply_fakequant(x, scale, inv_scale, zp, min_val, max_val, o_ref.dtype)


def _two_pass(x2, out_dtype, *, min_val, max_val, is_symmetric,
              target_tile_bytes=2 * 1024 * 1024):
    rows, lane_w = x2.shape

    tile_rows = max(8, (target_tile_bytes // (lane_w * 4)) // 8 * 8)
    tile_rows = min(tile_rows, _round_up(rows, 8))
    n_tiles = (rows + tile_rows - 1) // tile_rows

    # Split the reduction across both v7x TensorCores whenever there is more than one
    # tile; odd tile counts overhang by one tile, which is clamped in the index_map and
    # fully masked in the kernel.  (Harmless single-core serial loop on v5e/v6e.)
    n_cores = 2 if n_tiles >= 2 else 1
    n_inner = -(-n_tiles // n_cores)          # cdiv

    def x_index_map(c, i):
        t = jnp.minimum(c * n_inner + i, n_tiles - 1)   # clamp the overhanging tile
        return (t, 0)

    mm_kernel = functools.partial(_minmax_kernel, tile_rows=tile_rows,
                                  valid_rows=rows, n_inner=n_inner)
    mn_parts, mx_parts = pl.pallas_call(
        mm_kernel,
        out_shape=(jax.ShapeDtypeStruct((n_cores * 8, lane_w), jnp.float32),
                   jax.ShapeDtypeStruct((n_cores * 8, lane_w), jnp.float32)),
        grid_spec=pltpu.PrefetchScalarGridSpec(
            num_scalar_prefetch=0,
            grid=(n_cores, n_inner),
            in_specs=[pl.BlockSpec((tile_rows, lane_w), x_index_map)],
            out_specs=(pl.BlockSpec((8, lane_w), lambda c, i: (c, 0)),
                       pl.BlockSpec((8, lane_w), lambda c, i: (c, 0)))),
        compiler_params=pltpu.CompilerParams(
            dimension_semantics=("parallel", "arbitrary"),
            vmem_limit_bytes=_TWO_PASS_VMEM_LIMIT),
    )(x2)

    # Final collapse to scalars + qparam glue (tiny, done once in XLA).
    mn = jnp.min(mn_parts)
    mx = jnp.max(mx_parts)
    scale, zp = _scale_zp(mn, mx, min_val=min_val, max_val=max_val,
                          is_symmetric=is_symmetric)
    inv_scale = (1.0 / scale).astype(jnp.float32)
    params = jnp.stack([inv_scale, scale, zp]).astype(jnp.float32)   # (3,) -> SMEM

    q_kernel = functools.partial(_quant_kernel, min_val=min_val, max_val=max_val)
    out2 = pl.pallas_call(
        q_kernel,
        out_shape=jax.ShapeDtypeStruct((rows, lane_w), out_dtype),
        grid_spec=pltpu.PrefetchScalarGridSpec(
            num_scalar_prefetch=0,
            grid=(n_tiles,),
            in_specs=[pl.BlockSpec(memory_space=pltpu.MemorySpace.SMEM),
                      pl.BlockSpec((tile_rows, lane_w), lambda i: (i, 0))],
            out_specs=pl.BlockSpec((tile_rows, lane_w), lambda i: (i, 0))),
        compiler_params=pltpu.CompilerParams(
            dimension_semantics=("parallel",),
            vmem_limit_bytes=_TWO_PASS_VMEM_LIMIT),
    )(params, x2)
    return out2


# ----------------------------------------------------------------------------
# Public wrapper.
# ----------------------------------------------------------------------------
def fake_quantize(x, *, num_bits=8, is_symmetric=True, granularity="per_tensor",
                  fuse_limit_bytes=None, two_pass_tile_bytes=2 * 1024 * 1024):
    if granularity != "per_tensor":
        # TODO(synk): the reference's 'per_channel' branch reduces over dim=-1 and then
        # views scales as [1,...,C], which is shape-inconsistent in general; only the
        # default 'per_tensor' path is implemented.
        raise NotImplementedError("only per_tensor granularity is implemented")

    min_val = -(2 ** (num_bits - 1))
    max_val = 2 ** (num_bits - 1) - 1

    # Generation-aware fused-path budget: big-VMEM chips (v5e/v6e, 128 MiB physical) fuse
    # larger tensors; v7x/unknown keeps the fused (single-TensorCore) path modest so large
    # tensors take the dual-core two-pass path instead.
    vmem_cap = _tpu_vmem_capacity_bytes()
    big_vmem = vmem_cap is not None and vmem_cap >= 100 * 1024 * 1024
    fused_vmem_limit = (64 if big_vmem else 32) * 1024 * 1024
    if fuse_limit_bytes is None:
        fuse_limit_bytes = (8 if big_vmem else 4) * 1024 * 1024

    orig_shape = x.shape
    orig_dtype = x.dtype

    flat = x.reshape(-1)
    total = flat.size
    lane_w = _choose_lane_width(total)
    if lane_w is None:
        # Pad with the edge value (a value already in the tensor, so min/max and hence
        # scale/zp are unchanged); padded outputs are sliced off below.
        # TODO(synk): for very large non-multiple-of-128 tensors this pad materializes a
        # copy; a masked tail tile in-kernel would avoid it.
        pad = (-total) % 128
        flat = jnp.pad(flat, (0, pad), mode="edge")
        lane_w = _choose_lane_width(flat.size)
    padded_total = flat.size
    rows = padded_total // lane_w
    x2 = flat.reshape(rows, lane_w)          # lane-dense 2D slab (reshape is free)

    if padded_total * 4 <= fuse_limit_bytes:
        out2 = _fused_call(x2, orig_dtype, min_val=min_val, max_val=max_val,
                           is_symmetric=is_symmetric,
                           vmem_limit_bytes=fused_vmem_limit)
    else:
        out2 = _two_pass(x2, orig_dtype, min_val=min_val, max_val=max_val,
                         is_symmetric=is_symmetric,
                         target_tile_bytes=two_pass_tile_bytes)

    out_flat = out2.reshape(-1)
    if padded_total != total:
        out_flat = out_flat[:total]
    return out_flat.reshape(orig_shape)


# ----------------------------------------------------------------------------
# Pure-JAX reference (same formulation) + verification helpers.
# ----------------------------------------------------------------------------
def _reference_fake_quantize(x, *, num_bits=8, is_symmetric=True):
    min_val = -(2 ** (num_bits - 1))
    max_val = 2 ** (num_bits - 1) - 1
    xf = x.astype(jnp.float32)
    mn, mx = jnp.min(xf), jnp.max(xf)
    scale, zp = _scale_zp(mn, mx, min_val=min_val, max_val=max_val,
                          is_symmetric=is_symmetric)
    inv_scale = 1.0 / scale
    out = _apply_fakequant(xf, scale, inv_scale, zp, min_val, max_val, x.dtype)
    return out, scale


def _check(out, ref, scale, name, tol_factor=1.001):
    diff = jnp.abs(out.astype(jnp.float32) - ref.astype(jnp.float32))
    max_diff = float(jnp.max(diff))
    n_bad = float(jnp.sum(diff > 1e-6))
    s = float(scale)
    # Tolerate at most a single quantization step on a handful of elements (FP rounding
    # differences); systematic errors (wrong scale/zp/min/max) blow past these bounds.
    assert max_diff <= s * tol_factor + 1e-7, (name, max_diff, s)
    assert n_bad <= max(2.0, 1e-3 * diff.size), (name, n_bad, diff.size)


if __name__ == "__main__":
    root = jax.random.PRNGKey(0)
    k0, k1, k2 = jax.random.split(root, 3)

    # Small NCHW tensor (module's generic tensor forward) -> fused single-pass path.
    x = jax.random.normal(k0, (2, 4, 16, 16), dtype=jnp.float32) * 3.0

    out = jax.block_until_ready(fake_quantize(x))                        # symmetric (default)
    ref, scale = _reference_fake_quantize(x)
    assert out.shape == x.shape and out.dtype == x.dtype
    _check(out, ref, scale, "sym_fused")

    out_a = jax.block_until_ready(fake_quantize(x, is_symmetric=False))  # asymmetric
    ref_a, scale_a = _reference_fake_quantize(x, is_symmetric=False)
    _check(out_a, ref_a, scale_a, "asym_fused")

    # Odd-sized tensor: exercises the 128-lane padding fallback.
    x_odd = jax.random.normal(k1, (5, 7, 11), dtype=jnp.float32)
    out_o = jax.block_until_ready(fake_quantize(x_odd))
    ref_o, scale_o = _reference_fake_quantize(x_odd)
    assert out_o.shape == x_odd.shape
    _check(out_o, ref_o, scale_o, "odd_fused")

    # Larger tensor forced down the two-pass path with a small tile size so the test
    # exercises: odd tile count (dual-core split with a masked overhanging tile) and a
    # partial last tile.
    xb = jax.random.normal(k2, (8, 136, 160), dtype=jnp.float32) * 2.0 + 0.5
    out_b = jax.block_until_ready(
        fake_quantize(xb, fuse_limit_bytes=0, two_pass_tile_bytes=64 * 1024))
    ref_b, scale_b = _reference_fake_quantize(xb)
    _check(out_b, ref_b, scale_b, "sym_two_pass_odd_tiles")

    # Same tensor, even tile count + asymmetric config.
    out_ba = jax.block_until_ready(
        fake_quantize(xb, is_symmetric=False, fuse_limit_bytes=0,
                      two_pass_tile_bytes=128 * 1024))
    ref_ba, scale_ba = _reference_fake_quantize(xb, is_symmetric=False)
    _check(out_ba, ref_ba, scale_ba, "asym_two_pass_even_tiles")

    # Two-pass with the default (large) tile size as well.
    out_bd = jax.block_until_ready(fake_quantize(xb, fuse_limit_bytes=0))
    _check(out_bd, ref_b, scale_b, "sym_two_pass_default_tiles")

    # bf16 input: output dtype is preserved.
    x_bf = (jax.random.normal(k0, (2, 4, 16, 16)) * 3.0).astype(jnp.bfloat16)
    out_bf = jax.block_until_ready(fake_quantize(x_bf))
    ref_bf, scale_bf = _reference_fake_quantize(x_bf)
    assert out_bf.dtype == jnp.bfloat16
    _check(out_bf, ref_bf, scale_bf, "bf16_fused", tol_factor=1.05)

    print("KERNEL_OK")
</pallas_src>

<mosaic_0001>
module attributes {stable_mosaic.version = 11 : i64} {
  func.func @_fused_kernel(%arg0: i32, %arg1: memref<4x512xf32, #tpu.memory_space<vmem>>, %arg2: memref<4x512xf32, #tpu.memory_space<vmem>>) attributes {dimension_semantics = [#tpu.dimension_semantics<arbitrary>], iteration_bounds = array<i64: 1>, scalar_prefetch = 0 : i64, scratch_operands = 0 : i64, tpu.core_type = #tpu.core_type<tc>, window_params = [{pipeline_mode = #tpu.pipeline_mode<synchronous>, transform_indices = @transform_0, window_bounds = array<i64: 4, 512>}, {pipeline_mode = #tpu.pipeline_mode<synchronous>, transform_indices = @transform_1, window_bounds = array<i64: 4, 512>}]} {
    %c0 = arith.constant 0 : index
    %c0_0 = arith.constant 0 : index
    %0 = vector.load %arg1[%c0, %c0_0] : memref<4x512xf32, #tpu.memory_space<vmem>>, vector<4x512xf32>
    %1 = vector.shape_cast %0 : vector<4x512xf32> to vector<1x4x512xf32>
    %cst = arith.constant dense<0x7F800000> : vector<1xf32>
    %2 = vector.multi_reduction <minimumf>, %1, %cst [1, 2] : vector<1x4x512xf32> to vector<1xf32>
    %3 = vector.shape_cast %2 : vector<1xf32> to vector<1x1x1xf32>
    %4 = vector.extract %3[0, 0, 0] : f32 from vector<1x1x1xf32>
    %5 = vector.shape_cast %0 : vector<4x512xf32> to vector<1x4x512xf32>
    %cst_1 = arith.constant dense<0xFF800000> : vector<1xf32>
    %6 = vector.multi_reduction <maximumf>, %5, %cst_1 [1, 2] : vector<1x4x512xf32> to vector<1xf32>
    %7 = vector.shape_cast %6 : vector<1xf32> to vector<1x1x1xf32>
    %8 = vector.extract %7[0, 0, 0] : f32 from vector<1x1x1xf32>
    %9 = math.absf %4 : f32
    %10 = math.absf %8 : f32
    %11 = arith.maximumf %9, %10 : f32
    %cst_2 = arith.constant 1.270000e+02 : f32
    %12 = arith.divf %11, %cst_2 : f32
    %cst_3 = arith.constant 9.99999996E-13 : f32
    %13 = arith.maximumf %12, %cst_3 : f32
    %cst_4 = arith.constant 1.000000e+00 : f32
    %14 = arith.divf %cst_4, %13 : f32
    %15 = vector.broadcast %14 : f32 to vector<4x512xf32>
    %16 = arith.mulf %0, %15 : vector<4x512xf32>
    %cst_5 = arith.constant 0.000000e+00 : f32
    %17 = vector.broadcast %cst_5 : f32 to vector<4x512xf32>
    %18 = arith.addf %16, %17 : vector<4x512xf32>
    %19 = math.roundeven %18 : vector<4x512xf32>
    %c-128_i32 = arith.constant -128 : i32
    %c127_i32 = arith.constant 127 : i32
    %20 = arith.sitofp %c-128_i32 : i32 to f32
    %21 = vector.broadcast %20 : f32 to vector<4x512xf32>
    %22 = arith.maximumf %21, %19 : vector<4x512xf32>
    %23 = arith.sitofp %c127_i32 : i32 to f32
    %24 = vector.broadcast %23 : f32 to vector<4x512xf32>
    %25 = arith.minimumf %24, %22 : vector<4x512xf32>
    %cst_6 = arith.constant 0.000000e+00 : f32
    %26 = vector.broadcast %cst_6 : f32 to vector<4x512xf32>
    %27 = arith.subf %25, %26 : vector<4x512xf32>
    %28 = vector.broadcast %13 : f32 to vector<4x512xf32>
    %29 = arith.mulf %27, %28 : vector<4x512xf32>
    %c0_7 = arith.constant 0 : index
    %c0_8 = arith.constant 0 : index
    %30 = vector.load %arg2[%c0_7, %c0_8] : memref<4x512xf32, #tpu.memory_space<vmem>>, vector<4x512xf32>
    tpu.vector_store %arg2[%c0_7, %c0_8], %29 {strides = array<i32>} : memref<4x512xf32, #tpu.memory_space<vmem>>, vector<4x512xf32>,
    return
  }
  func.func @transform_0(%arg0: i32) -> (i32, i32) {
    %c0_i32 = arith.constant 0 : i32
    %c0_i32_0 = arith.constant 0 : i32
    %c0_i32_1 = arith.constant 0 : i32
    return %c0_i32, %c0_i32_0 : i32, i32
  }
  func.func @transform_1(%arg0: i32) -> (i32, i32) {
    %c0_i32 = arith.constant 0 : i32
    %c0_i32_0 = arith.constant 0 : i32
    %c0_i32_1 = arith.constant 0 : i32
    return %c0_i32, %c0_i32_0 : i32, i32
  }
}

</mosaic_0001>

<bundles_post_ra>
// kernel: tpu_custom_call.1
= control target key start
LH: loop header
LB: loop body
LE: loop exit
PB: predicated region body
PF: predicated region fallthrough
CT: control target
= control target key end

     0   :  { %6 = vsyncpa [#allocation3], 0  ;;  %s203_s0 = inlined_call_operand.hbm [shape: f32[4,512], index: 0, kind: input, shape index: {}]   ;;  %s204_s1 = inlined_call_operand.hbm [shape: f32[4,512], index: 1, kind: output, shape index: {}]  }
   0x1   :  { %7 = vsyncpa [#allocation4], 0  ;;  %s166_s6 = smov [#allocation2]   ;;  %s118_s10 = scalar_lea.hbm %s203_s0, 256 }
   0x2   :  { %s14_s7 = sshll.u32 %s166_s6, 4  ;;  %p119_p0 = scmp.ne.s32.totalorder %s203_s0, %s118_s10  ;;  %s15_s7 = int_to_ptr.vmem [resolvable:$true] %s14_s7 }
   0x3   :  { %p122_p1 = scmp.lt.u32.totalorder %s118_s10, %s203_s0 }
   0x5   :  { %p124_p2 = pnand %p122_p1, %p119_p0 }
   0x7   :  { %127 = shalt.err (!%p124_p2)
}
   0x8   :  { %s128_s15 = scalar_lea.vmem %s15_s7, 256  ;;  %p133_p4 = scmp.lt.s32.totalorder %s15_s7, %s15_s7 }
   0x9   :  { %p129_p3 = scmp.ne.s32.totalorder %s15_s7, %s128_s15  ;;  %p134_p5 = scmp.lt.s32.totalorder %s128_s15, %s128_s15 }
   0xb   :  { %p135_p6 = por %p134_p5, %p133_p4 }
   0xd   :  { %p136_p7 = pnand %p135_p6, %p129_p3 }
   0xf   :  { %139 = shalt.err (!%p136_p7)
}
  0x10   :  { %17 = dma.hbm_to_vmem [thread:$0]  %s203_s0, 256, %s15_s7, [#allocation3]  }
  0x11   :  { %162 = dma.done.wait [#allocation3], 256  }
  0x12   :  { %163 = vsyncadd [#allocation3], 4294967040  ;;  %vm29_vm0 = vcmask 1043456   ;;  %v21_v0 = vld [vmem:[#allocation2] sm:$0xff]  ;;  %v22_v1 = vld [vmem:[#allocation2 + $0x8] sm:$0xff]  ;;  %s168_s26 = smov [#allocation5]  }
  0x13   :  { %v25_v2 = vcombine.high %v21_v0, %v21_v0  ;;  %v26_v3 = vcombine.high %v22_v1, %v22_v1  ;;  %v30_v4 = vsel %vm29_vm0, %v21_v0, inf  ;;  %v32_v5 = vsel %vm29_vm0, %v22_v1, inf  ;;  %s167_s23 = smov 1e-12   ;;  %s94_s27 = sshll.u32 %s168_s26, 4  ;;  %s95_s27 = int_to_ptr.vmem [resolvable:$true] %s94_s27 }
  0x14   :  { %v46_v6 = vsel %vm29_vm0, %v21_v0, -inf  ;;  %v48_v7 = vsel %vm29_vm0, %v22_v1, -inf  ;;  %s140_s28 = scalar_lea.vmem %s95_s27, 256  ;;  %p145_p9 = scmp.lt.s32.totalorder %s95_s27, %s95_s27 }
  0x15   :  { %v31_v8 = vsel %vm29_vm0, %v25_v2, inf  ;;  %v33_v9 = vsel %vm29_vm0, %v26_v3, inf  ;;  %v47_v10 = vsel %vm29_vm0, %v25_v2, -inf  ;;  %v49_v11 = vsel %vm29_vm0, %v26_v3, -inf  ;;  %p141_p8 = scmp.ne.s32.totalorder %s95_s27, %s140_s28  ;;  %p146_p10 = scmp.lt.s32.totalorder %s140_s28, %s140_s28 }
  0x16   :  { %v34_v12 = vmin.f32 %v30_v4, %v31_v8  ;;  %v35_v13 = vmin.f32 %v32_v5, %v33_v9  ;;  %v50_v14 = vmax.f32 %v46_v6, %v47_v10  ;;  %v51_v15 = vmax.f32 %v48_v7, %v49_v11 }
  0x17   :  { %p147_p11 = por %p146_p10, %p145_p9 }
  0x18   :  { %v36_v16 = vmin.f32 %v34_v12, %v35_v13  ;;  %v52_v17 = vmax.f32 %v50_v14, %v51_v15 }
  0x19   :  { %p148_p12 = pnand %p147_p11, %p141_p8 }
  0x1a   :  { %37 = vmin.xlane.f32.xlu0 %v36_v16 }
  0x1e   :  { %53 = vmax.xlane.f32.xlu0 %v52_v17 }
  0xa7   :  { %v38_v18 = vpop.xlane.xlu0 %37 }
  0xa8   :  { %v39_v19 = vrot.slane %v38_v18, 4 }
  0xaa   :  { %v40_v20 = vmin.f32 %v38_v18, %v39_v19 }
  0xab   :  { %v54_v21 = vpop.xlane.xlu0 %53 }
  0xac   :  { %v41_v22 = vrot.slane %v40_v20, 2  ;;  %v55_v23 = vrot.slane %v54_v21, 4 }
  0xae   :  { %v56_v24 = vmax.f32 %v54_v21, %v55_v23  ;;  %v42_v25 = vmin.f32 %v40_v20, %v41_v22 }
  0xb0   :  { %v57_v26 = vrot.slane %v56_v24, 2  ;;  %v43_v27 = vrot.slane %v42_v25, 1 }
  0xb2   :  { %v58_v28 = vmax.f32 %v56_v24, %v57_v26  ;;  %v44_v29 = vmin.f32 %v42_v25, %v43_v27 }
  0xb4   :  { %103 = vpush %v44_v29  ;;  %v59_v30 = vrot.slane %v58_v28, 1 }
  0xb6   :  { %v60_v31 = vmax.f32 %v58_v28, %v59_v30 }
  0xb8   :  { %105 = vpush %v60_v31 }
  0xe5   :  { %s104_s0 = spop %103 }
  0xe6   :  { %s62_s19 = sand.u32 2147483647, %s104_s0 }
  0xe9   :  { %s106_s18 = spop %105 }
  0xea   :  { %s63_s20 = sand.u32 2147483647, %s106_s18 }
  0xeb   :  { %s64_s21 = smax.f32 %s63_s20, %s62_s19 }
  0xec   :  { %s67_s22 = smul.f32 0.007874016, %s64_s21 }
  0xee   :  { %s68_s24 = smax.f32 %s167_s23, %s67_s22 }
  0xef   :  { %v69_v32 = vstv %s68_s24 }
  0xf0   :  { %116 = vrcp.f32 %v69_v32 }
  0xfa   :  { %v117_v33 = vpop.eup %116 }
  0xfb   :  { %107 = vpush %v117_v33 }
 0x12c   :  { %s108_s25 = spop %107 }
 0x12d   :  { %v72_v34 = vstv %s108_s25 }
 0x12e   :  { %v73_v35 = vmul.f32 %v72_v34, %v21_v0  ;;  %v74_v36 = vmul.f32 %v72_v34, %v22_v1 }
 0x130   :  { %v109_v37 = vround.rtne.f32 %v73_v35  ;;  %v110_v38 = vround.rtne.f32 %v74_v36 }
 0x132   :  { %v79_v39 = vmax.f32 %v109_v37, -128.0  ;;  %v80_v40 = vmax.f32 %v110_v38, -128.0 }
 0x134   :  { %v81_v41 = vmin.f32 %v79_v39, 127.0  ;;  %v82_v42 = vmin.f32 %v80_v40, 127.0 }
 0x136   :  { %v84_v43 = vmul.f32 %v81_v41, %v69_v32  ;;  %v85_v44 = vmul.f32 %v82_v42, %v69_v32 }
 0x138   :  { %86 = vst [vmem:[#allocation5] sm:$0xff] %v84_v43  ;;  %87 = vst [vmem:[#allocation5 + $0x8] sm:$0xff] %v85_v44 }
 0x139   :  { %151 = shalt.err (!%p148_p12)
}
 0x13a   :  { %s152_s2 = scalar_lea.hbm %s204_s1, 256 }
 0x13b   :  { %p153_p13 = scmp.ne.s32.totalorder %s204_s1, %s152_s2  ;;  %p156_p0 = scmp.lt.u32.totalorder %s152_s2, %s204_s1 }
 0x13d   :  { %p158_p1 = pnand %p156_p0, %p153_p13 }
 0x13f   :  { %161 = shalt.err (!%p158_p1)
}
 0x140   :  { %97 = dma.vmem_to_hbm [thread:$0]  %s95_s27, 256, %s204_s1, [#allocation4]  }
 0x141   :  { %164 = dma.done.wait [#allocation4], 256  }
 0x142   :  { %165 = vsyncadd [#allocation4], 4294967040 }
 0x143   :  { %101 = vsyncpa [#allocation3], 1 }
 0x144   :  { %102 = vsyncpa [#allocation4], 1 }

</bundles_post_ra>
